<compile_context>
chip_gen: v7x
topology: tpu7x:2x2x1
jax: 0.10.0
libtpu: 0.0.40
codegen_flags: <defaults>
</compile_context>

<pallas_src>
import functools
from typing import NamedTuple

import jax
import jax.numpy as jnp
from jax.experimental import pallas as pl
from jax.experimental.pallas import tpu as pltpu


HIDDEN1 = 512
HIDDEN2 = 256
LANE = 128
SUBLANE_PACK = 16   # bf16 rows per packed sublane group -> tile row alignment


def _round_up(x, m):
    return ((x + m - 1) // m) * m


def _policy_kernel(x_ref, w1_ref, b1_ref, w2_ref, b2_ref, w3_ref, b3_ref, o_ref):
    # One batch tile of the 3-layer MLP. MXU inputs bf16, accumulation and all
    # post-matmul elementwise math in f32; bf16 writeback of the tanh output.
    x = x_ref[...].astype(jnp.bfloat16)                                   # (TB, D_in)
    h1 = jnp.dot(x, w1_ref[...], preferred_element_type=jnp.float32) + b1_ref[...]
    h1 = jnp.maximum(h1, 0.0).astype(jnp.bfloat16)                        # ReLU (f32 math)
    h2 = jnp.dot(h1, w2_ref[...], preferred_element_type=jnp.float32) + b2_ref[...]
    h2 = jnp.maximum(h2, 0.0).astype(jnp.bfloat16)                        # ReLU (f32 math)
    z = jnp.dot(h2, w3_ref[...], preferred_element_type=jnp.float32) + b3_ref[...]
    o_ref[...] = jnp.tanh(z).astype(jnp.bfloat16)                         # (TB, 128) lane-dense


class PackedPolicyParams(NamedTuple):
    w1: jax.Array   # (d_in, 512)  bf16
    b1: jax.Array   # (1, 512)     f32
    w2: jax.Array   # (512, 256)   bf16
    b2: jax.Array   # (1, 256)     f32
    w3: jax.Array   # (256, 128)   bf16 (lane-padded)
    b3: jax.Array   # (1, 128)     f32  (lane-padded)
    n_out: int      # true (unpadded) action dim


def pack_policy_params(params):
    """One-time parameter packing, hoisted out of the per-call forward:
    bf16 weights for the MXU, f32 biases, last layer zero-padded to a
    lane-dense 128-wide output column."""
    w1, b1, w2, b2, w3, b3 = params
    n_out = w3.shape[1]
    n_out_pad = _round_up(n_out, LANE)
    return PackedPolicyParams(
        w1=w1.astype(jnp.bfloat16),
        b1=b1.astype(jnp.float32),
        w2=w2.astype(jnp.bfloat16),
        b2=b2.astype(jnp.float32),
        w3=jnp.pad(w3, ((0, 0), (0, n_out_pad - n_out))).astype(jnp.bfloat16),
        b3=jnp.pad(b3.astype(jnp.float32), ((0, 0), (0, n_out_pad - n_out))),
        n_out=n_out,
    )


def policy_forward(x, packed: PackedPolicyParams, *, batch_tile=1024):
    """x: (B, H, W) or (B, H*W) float32; packed: PackedPolicyParams.
    Returns (B, outputs) float32 (matches torch Policy.forward semantics)."""
    w1p, b1p, w2p, b2p, w3p, b3p, n_out = packed
    d_in = w1p.shape[0]
    h1_dim = w1p.shape[1]
    h2_dim = w2p.shape[1]
    n_out_pad = w3p.shape[1]

    total = 1
    for s in x.shape:
        total *= s
    assert total % d_in == 0, (
        f"input with {total} elements cannot be viewed as (-1, {d_in})")
    x2d = x.reshape(-1, d_in).astype(jnp.float32)   # f32 goes straight to the kernel
    batch = x2d.shape[0]

    # Tile choice: bound batch-padding waste to < one tile instead of always
    # padding up to batch_tile (e.g. B=520 -> tb=272, 24 padded rows not 504).
    num_tiles = max(1, -(-batch // batch_tile))
    tb = _round_up(-(-batch // num_tiles), SUBLANE_PACK)
    padded = _round_up(batch, tb)
    if padded != batch:
        x2d = jnp.pad(x2d, ((0, padded - batch), (0, 0)))
    grid = (padded // tb,)

    # VMEM footprint estimate: double-buffered f32 x tile + bf16 out tile,
    # double-buffered resident weights/biases, f32+bf16 intermediates, headroom.
    # Never set the limit below the 32 MiB scoped default (it would only
    # constrain the scheduler; real footprint is far under every gen's VMEM).
    wbytes = 2 * (2 * (d_in * h1_dim + h1_dim * h2_dim + h2_dim * n_out_pad)
                  + 4 * (h1_dim + h2_dim + n_out_pad))
    abytes = 2 * (4 * tb * d_in + 2 * tb * n_out_pad)
    sbytes = tb * ((h1_dim + h2_dim) * 6 + n_out_pad * 4 + d_in * 2)
    vmem_bytes = int(max(wbytes + abytes + sbytes + (4 << 20), 32 << 20))

    out = pl.pallas_call(
        _policy_kernel,
        out_shape=jax.ShapeDtypeStruct((padded, n_out_pad), jnp.bfloat16),
        grid=grid,
        in_specs=[
            pl.BlockSpec((tb, d_in), lambda i: (i, 0)),             # x: tiled over batch
            pl.BlockSpec((d_in, h1_dim), lambda i: (0, 0)),          # weights/biases: resident
            pl.BlockSpec((1, h1_dim), lambda i: (0, 0)),
            pl.BlockSpec((h1_dim, h2_dim), lambda i: (0, 0)),
            pl.BlockSpec((1, h2_dim), lambda i: (0, 0)),
            pl.BlockSpec((h2_dim, n_out_pad), lambda i: (0, 0)),
            pl.BlockSpec((1, n_out_pad), lambda i: (0, 0)),
        ],
        out_specs=pl.BlockSpec((tb, n_out_pad), lambda i: (i, 0)),
        compiler_params=pltpu.CompilerParams(
            dimension_semantics=("parallel",),
            vmem_limit_bytes=vmem_bytes,
        ),
    )(x2d, w1p, b1p, w2p, b2p, w3p, b3p)

    return out[:batch, :n_out].astype(jnp.float32)


def init_policy_params(key, inputs2d, outputs, hidden1=HIDDEN1, hidden2=HIDDEN2):
    """Deterministic synthetic parameters (nn.Linear-style init), stored as
    (in, out) weights and (1, out) biases in f32."""
    d_in = inputs2d[0] * inputs2d[1]
    k = jax.random.split(key, 6)

    def lin(kw, kb, fan_in, fan_out):
        bound = 1.0 / jnp.sqrt(fan_in)
        w = jax.random.uniform(kw, (fan_in, fan_out), jnp.float32, -bound, bound)
        b = jax.random.uniform(kb, (1, fan_out), jnp.float32, -bound, bound)
        return w, b

    w1, b1 = lin(k[0], k[1], d_in, hidden1)
    w2, b2 = lin(k[2], k[3], hidden1, hidden2)
    w3, b3 = lin(k[4], k[5], hidden2, outputs)
    return (w1, b1, w2, b2, w3, b3)


def policy_ref(x, params):
    """Pure-JAX f32 reference (PyTorch semantics) for correctness checking."""
    w1, b1, w2, b2, w3, b3 = params
    x2d = x.reshape(-1, w1.shape[0]).astype(jnp.float32)
    h1 = jax.nn.relu(x2d @ w1 + b1)
    h2 = jax.nn.relu(h1 @ w2 + b2)
    return jnp.tanh(h2 @ w3 + b3)


if __name__ == "__main__":
    key = jax.random.PRNGKey(0)
    k_x, k_p = jax.random.split(key)

    inputs2d = (16, 16)   # -> inputs1D = 256
    outputs = 3           # CarRacing action dim
    batch = 2

    params = init_policy_params(k_p, inputs2d, outputs)
    packed = pack_policy_params(params)          # one-time packing, reused per call
    x = jax.random.normal(k_x, (batch, inputs2d[0], inputs2d[1]), jnp.float32)

    y = jax.block_until_ready(policy_forward(x, packed))
    y_ref = policy_ref(x, params)

    assert y.shape == (batch, outputs)
    # bf16 weights / MXU inputs / output writeback (intentional) -> loosened
    # tolerance vs the pure-f32 reference.
    max_diff = jnp.max(jnp.abs(y - y_ref))
    assert jnp.allclose(y, y_ref, atol=5e-2, rtol=5e-2), (
        f"mismatch vs JAX reference (max abs diff {max_diff})")

    print("KERNEL_OK")
</pallas_src>

<mosaic_0001>
module attributes {stable_mosaic.version = 11 : i64} {
  func.func @_policy_kernel(%arg0: i32, %arg1: memref<16x256xf32, #tpu.memory_space<vmem>>, %arg2: memref<256x512xbf16, #tpu.memory_space<vmem>>, %arg3: memref<1x512xf32, #tpu.memory_space<vmem>>, %arg4: memref<512x256xbf16, #tpu.memory_space<vmem>>, %arg5: memref<1x256xf32, #tpu.memory_space<vmem>>, %arg6: memref<256x128xbf16, #tpu.memory_space<vmem>>, %arg7: memref<1x128xf32, #tpu.memory_space<vmem>>, %arg8: memref<16x128xbf16, #tpu.memory_space<vmem>>) attributes {dimension_semantics = [#tpu.dimension_semantics<parallel>], iteration_bounds = array<i64: 1>, scalar_prefetch = 0 : i64, scratch_operands = 0 : i64, tpu.core_type = #tpu.core_type<tc>, window_params = [{transform_indices = @transform_0, window_bounds = array<i64: 16, 256>}, {pipeline_mode = #tpu.pipeline_mode<synchronous>, transform_indices = @transform_1, window_bounds = array<i64: 256, 512>}, {pipeline_mode = #tpu.pipeline_mode<synchronous>, transform_indices = @transform_2, window_bounds = array<i64: 1, 512>}, {pipeline_mode = #tpu.pipeline_mode<synchronous>, transform_indices = @transform_3, window_bounds = array<i64: 512, 256>}, {pipeline_mode = #tpu.pipeline_mode<synchronous>, transform_indices = @transform_4, window_bounds = array<i64: 1, 256>}, {pipeline_mode = #tpu.pipeline_mode<synchronous>, transform_indices = @transform_5, window_bounds = array<i64: 256, 128>}, {pipeline_mode = #tpu.pipeline_mode<synchronous>, transform_indices = @transform_6, window_bounds = array<i64: 1, 128>}, {transform_indices = @transform_7, window_bounds = array<i64: 16, 128>}]} {
    %c0 = arith.constant 0 : index
    %c0_0 = arith.constant 0 : index
    %0 = vector.load %arg1[%c0, %c0_0] : memref<16x256xf32, #tpu.memory_space<vmem>>, vector<16x256xf32>
    %1 = arith.truncf %0 : vector<16x256xf32> to vector<16x256xbf16>
    %c0_1 = arith.constant 0 : index
    %c0_2 = arith.constant 0 : index
    %2 = vector.load %arg2[%c0_1, %c0_2] : memref<256x512xbf16, #tpu.memory_space<vmem>>, vector<256x512xbf16>
    %cst = arith.constant dense<0.000000e+00> : vector<16x512xf32>
    %3 = tpu.matmul %1, %2, %cst {dimension_numbers = #tpu.dot_dimension_numbers<[1], [0], [0], [1], [0, 0, 1, 1], [], []>} : vector<16x256xbf16>, vector<256x512xbf16>, vector<16x512xf32> -> vector<16x512xf32>
    %c0_3 = arith.constant 0 : index
    %c0_4 = arith.constant 0 : index
    %4 = vector.load %arg3[%c0_3, %c0_4] : memref<1x512xf32, #tpu.memory_space<vmem>>, vector<1x512xf32>
    %5 = vector.broadcast %4 : vector<1x512xf32> to vector<16x512xf32>
    %6 = arith.addf %3, %5 : vector<16x512xf32>
    %cst_5 = arith.constant 0.000000e+00 : f32
    %7 = vector.broadcast %cst_5 : f32 to vector<16x512xf32>
    %8 = arith.maximumf %6, %7 : vector<16x512xf32>
    %9 = arith.truncf %8 : vector<16x512xf32> to vector<16x512xbf16>
    %c0_6 = arith.constant 0 : index
    %c0_7 = arith.constant 0 : index
    %10 = vector.load %arg4[%c0_6, %c0_7] : memref<512x256xbf16, #tpu.memory_space<vmem>>, vector<512x256xbf16>
    %cst_8 = arith.constant dense<0.000000e+00> : vector<16x256xf32>
    %11 = tpu.matmul %9, %10, %cst_8 {dimension_numbers = #tpu.dot_dimension_numbers<[1], [0], [0], [1], [0, 0, 1, 1], [], []>} : vector<16x512xbf16>, vector<512x256xbf16>, vector<16x256xf32> -> vector<16x256xf32>
    %c0_9 = arith.constant 0 : index
    %c0_10 = arith.constant 0 : index
    %12 = vector.load %arg5[%c0_9, %c0_10] : memref<1x256xf32, #tpu.memory_space<vmem>>, vector<1x256xf32>
    %13 = vector.broadcast %12 : vector<1x256xf32> to vector<16x256xf32>
    %14 = arith.addf %11, %13 : vector<16x256xf32>
    %cst_11 = arith.constant 0.000000e+00 : f32
    %15 = vector.broadcast %cst_11 : f32 to vector<16x256xf32>
    %16 = arith.maximumf %14, %15 : vector<16x256xf32>
    %17 = arith.truncf %16 : vector<16x256xf32> to vector<16x256xbf16>
    %c0_12 = arith.constant 0 : index
    %c0_13 = arith.constant 0 : index
    %18 = vector.load %arg6[%c0_12, %c0_13] : memref<256x128xbf16, #tpu.memory_space<vmem>>, vector<256x128xbf16>
    %cst_14 = arith.constant dense<0.000000e+00> : vector<16x128xf32>
    %19 = tpu.matmul %17, %18, %cst_14 {dimension_numbers = #tpu.dot_dimension_numbers<[1], [0], [0], [1], [0, 0, 1, 1], [], []>} : vector<16x256xbf16>, vector<256x128xbf16>, vector<16x128xf32> -> vector<16x128xf32>
    %c0_15 = arith.constant 0 : index
    %c0_16 = arith.constant 0 : index
    %20 = vector.load %arg7[%c0_15, %c0_16] : memref<1x128xf32, #tpu.memory_space<vmem>>, vector<1x128xf32>
    %21 = vector.broadcast %20 : vector<1x128xf32> to vector<16x128xf32>
    %22 = arith.addf %19, %21 : vector<16x128xf32>
    %23 = math.tanh %22 : vector<16x128xf32>
    %24 = arith.truncf %23 : vector<16x128xf32> to vector<16x128xbf16>
    %c0_17 = arith.constant 0 : index
    %c0_18 = arith.constant 0 : index
    %25 = vector.load %arg8[%c0_17, %c0_18] : memref<16x128xbf16, #tpu.memory_space<vmem>>, vector<16x128xbf16>
    tpu.vector_store %arg8[%c0_17, %c0_18], %24 {strides = array<i32>} : memref<16x128xbf16, #tpu.memory_space<vmem>>, vector<16x128xbf16>,
    return
  }
  func.func @transform_0(%arg0: i32) -> (i32, i32) {
    %c0_i32 = arith.constant 0 : i32
    %c0_i32_0 = arith.constant 0 : i32
    return %arg0, %c0_i32 : i32, i32
  }
  func.func @transform_1(%arg0: i32) -> (i32, i32) {
    %c0_i32 = arith.constant 0 : i32
    %c0_i32_0 = arith.constant 0 : i32
    %c0_i32_1 = arith.constant 0 : i32
    return %c0_i32, %c0_i32_0 : i32, i32
  }
  func.func @transform_2(%arg0: i32) -> (i32, i32) {
    %c0_i32 = arith.constant 0 : i32
    %c0_i32_0 = arith.constant 0 : i32
    %c0_i32_1 = arith.constant 0 : i32
    return %c0_i32, %c0_i32_0 : i32, i32
  }
  func.func @transform_3(%arg0: i32) -> (i32, i32) {
    %c0_i32 = arith.constant 0 : i32
    %c0_i32_0 = arith.constant 0 : i32
    %c0_i32_1 = arith.constant 0 : i32
    return %c0_i32, %c0_i32_0 : i32, i32
  }
  func.func @transform_4(%arg0: i32) -> (i32, i32) {
    %c0_i32 = arith.constant 0 : i32
    %c0_i32_0 = arith.constant 0 : i32
    %c0_i32_1 = arith.constant 0 : i32
    return %c0_i32, %c0_i32_0 : i32, i32
  }
  func.func @transform_5(%arg0: i32) -> (i32, i32) {
    %c0_i32 = arith.constant 0 : i32
    %c0_i32_0 = arith.constant 0 : i32
    %c0_i32_1 = arith.constant 0 : i32
    return %c0_i32, %c0_i32_0 : i32, i32
  }
  func.func @transform_6(%arg0: i32) -> (i32, i32) {
    %c0_i32 = arith.constant 0 : i32
    %c0_i32_0 = arith.constant 0 : i32
    %c0_i32_1 = arith.constant 0 : i32
    return %c0_i32, %c0_i32_0 : i32, i32
  }
  func.func @transform_7(%arg0: i32) -> (i32, i32) {
    %c0_i32 = arith.constant 0 : i32
    %c0_i32_0 = arith.constant 0 : i32
    return %arg0, %c0_i32 : i32, i32
  }
}

</mosaic_0001>

<bundles_post_ra>
// kernel: tpu_custom_call.1
= control target key start
LH: loop header
LB: loop body
LE: loop exit
PB: predicated region body
PF: predicated region fallthrough
CT: control target
= control target key end

     0   :  { %12 = vsyncpa [#allocation3], 0  ;;  %s1974_s0 = inlined_call_operand.hbm [shape: f32[16,256], index: 0, kind: input, shape index: {}]   ;;  %s1975_s1 = inlined_call_operand.hbm [shape: bf16[256,512], index: 1, kind: input, shape index: {}]   ;;  %s1976_s2 = inlined_call_operand.vmem [shape: f32[1,512], index: 2, kind: input, shape index: {}]   ;;  %s1977_s3 = inlined_call_operand.hbm [shape: bf16[512,256], index: 3, kind: input, shape index: {}]   ;;  %s1978_s4 = inlined_call_operand.vmem [shape: f32[1,256], index: 4, kind: input, shape index: {}]   ;;  %s1979_s5 = inlined_call_operand.hbm [shape: bf16[256,128], index: 5, kind: input, shape index: {}]   ;;  %s1980_s6 = inlined_call_operand.vmem [shape: f32[1,128], index: 6, kind: input, shape index: {}]   ;;  %s1981_s7 = inlined_call_operand.hbm [shape: bf16[16,128], index: 7, kind: output, shape index: {}]  }
   0x1   :  { %13 = vsyncpa [#allocation6], 0 }
   0x2   :  { %14 = vsyncpa [#allocation9], 0 }
   0x3   :  { %15 = vsyncpa [#allocation4], 0  ;;  %s1813_s24 = smov [#allocation5]   ;;  %s1814_s26 = smov [#allocation2]  }
   0x4   :  { %s33_s25 = sshll.u32 %s1813_s24, 4  ;;  %s21_s27 = sshll.u32 %s1814_s26, 4  ;;  %s34_s25 = int_to_ptr.vmem [resolvable:$true] %s33_s25  ;;  %s1864_s27 = int_to_ptr.vmem [resolvable:$true] %s21_s27 }
   0x5   :  { %s1695_s30 = scalar_lea.hbm %s1975_s1, 8192 }
   0x6   :  { %p1696_p0 = scmp.ne.s32.totalorder %s1975_s1, %s1695_s30  ;;  %p1699_p1 = scmp.lt.u32.totalorder %s1695_s30, %s1975_s1 }
   0x8   :  { %p1701_p2 = pnand %p1699_p1, %p1696_p0 }
   0xa   :  { %1704 = shalt.err (!%p1701_p2)
}
   0xb   :  { %s1705_s12 = scalar_lea.vmem %s34_s25, 8192  ;;  %p1710_p4 = scmp.lt.s32.totalorder %s34_s25, %s34_s25 }
   0xc   :  { %p1706_p3 = scmp.ne.s32.totalorder %s34_s25, %s1705_s12  ;;  %p1711_p5 = scmp.lt.s32.totalorder %s1705_s12, %s1705_s12 }
   0xe   :  { %p1712_p6 = por %p1711_p5, %p1710_p4 }
  0x10   :  { %p1713_p7 = pnand %p1712_p6, %p1706_p3 }
  0x12   :  { %1716 = shalt.err (!%p1713_p7)
}
  0x13   :  { %s1815_s13 = smov 256   ;;  %s1816_s14 = smov 16  }
  0x14   :  { %39 = dma.hbm_to_vmem [thread:$0]  %s1975_s1, 8192, %s34_s25, [#allocation6], %s1815_s13, %s1815_s13, %s1816_s14  }
  0x15   :  { %s1717_s19 = scalar_lea.hbm %s1974_s0, 512 }
  0x16   :  { %p1718_p8 = scmp.ne.s32.totalorder %s1974_s0, %s1717_s19  ;;  %p1721_p9 = scmp.lt.u32.totalorder %s1717_s19, %s1974_s0 }
  0x18   :  { %p1723_p10 = pnand %p1721_p9, %p1718_p8 }
  0x1a   :  { %1726 = shalt.err (!%p1723_p10)
}
  0x1b   :  { %s1727_s24 = scalar_lea.vmem %s1864_s27, 512  ;;  %p1732_p12 = scmp.lt.s32.totalorder %s1864_s27, %s1864_s27 }
  0x1c   :  { %p1728_p11 = scmp.ne.s32.totalorder %s1864_s27, %s1727_s24  ;;  %p1733_p13 = scmp.lt.s32.totalorder %s1727_s24, %s1727_s24 }
  0x1e   :  { %p1734_p0 = por %p1733_p13, %p1732_p12 }
  0x20   :  { %p1735_p1 = pnand %p1734_p0, %p1728_p11 }
  0x22   :  { %1738 = shalt.err (!%p1735_p1)
}
  0x23   :  { %27 = dma.hbm_to_vmem [thread:$0]  %s1974_s0, 512, %s1864_s27, [#allocation3], %s1815_s13, %s1815_s13, %s1816_s14  }
  0x24   :  { %s1817_s26 = smov [#allocation7]   ;;  %s1739_s8 = scalar_lea.hbm %s1977_s3, 8192 }
  0x25   :  { %s47_s28 = sshll.u32 %s1817_s26, 4  ;;  %p1740_p2 = scmp.ne.s32.totalorder %s1977_s3, %s1739_s8  ;;  %s48_s28 = int_to_ptr.vmem [resolvable:$true] %s47_s28 }
  0x26   :  { %p1743_p3 = scmp.lt.u32.totalorder %s1739_s8, %s1977_s3 }
  0x28   :  { %p1745_p4 = pnand %p1743_p3, %p1740_p2 }
  0x2a   :  { %1748 = shalt.err (!%p1745_p4)
}
  0x2b   :  { %s1749_s15 = scalar_lea.vmem %s48_s28, 8192  ;;  %p1754_p6 = scmp.lt.s32.totalorder %s48_s28, %s48_s28 }
  0x2c   :  { %p1750_p5 = scmp.ne.s32.totalorder %s48_s28, %s1749_s15  ;;  %p1755_p7 = scmp.lt.s32.totalorder %s1749_s15, %s1749_s15 }
  0x2e   :  { %p1756_p8 = por %p1755_p7, %p1754_p6 }
  0x30   :  { %p1757_p9 = pnand %p1756_p8, %p1750_p5 }
  0x32   :  { %1760 = shalt.err (!%p1757_p9)
}
  0x33   :  { %s1818_s0 = smov 128   ;;  %s1819_s27 = smov 8  }
  0x34   :  { %53 = dma.hbm_to_vmem [thread:$0]  %s1977_s3, 8192, %s48_s28, [#allocation6], %s1818_s0, %s1818_s0, %s1819_s27  }
  0x35   :  { %s1820_s16 = smov [#allocation8]   ;;  %s1761_s20 = scalar_lea.hbm %s1979_s5, 2048 }
  0x36   :  { %s61_s17 = sshll.u32 %s1820_s16, 4  ;;  %p1762_p10 = scmp.ne.s32.totalorder %s1979_s5, %s1761_s20  ;;  %s62_s17 = int_to_ptr.vmem [resolvable:$true] %s61_s17 }
  0x37   :  { %p1765_p11 = scmp.lt.u32.totalorder %s1761_s20, %s1979_s5 }
  0x39   :  { %p1767_p12 = pnand %p1765_p11, %p1762_p10 }
  0x3b   :  { %1770 = shalt.err (!%p1767_p12)
}
  0x3c   :  { %s1771_s1 = scalar_lea.vmem %s62_s17, 2048  ;;  %p1776_p0 = scmp.lt.s32.totalorder %s62_s17, %s62_s17 }
  0x3d   :  { %p1772_p13 = scmp.ne.s32.totalorder %s62_s17, %s1771_s1  ;;  %p1777_p1 = scmp.lt.s32.totalorder %s1771_s1, %s1771_s1 }
  0x3f   :  { %p1778_p2 = por %p1777_p1, %p1776_p0 }
  0x41   :  { %p1779_p3 = pnand %p1778_p2, %p1772_p13 }
  0x43   :  { %1782 = shalt.err (!%p1779_p3)
}
  0x44   :  { %s1821_s3 = smov 64   ;;  %s1822_s25 = smov 4  }
  0x45   :  { %67 = dma.hbm_to_vmem [thread:$0]  %s1979_s5, 2048, %s62_s17, [#allocation9], %s1821_s3, %s1821_s3, %s1822_s25  }
  0x46   :  { %1805 = dma.done.wait [#allocation3], 512  }
  0x47   :  { %1806 = vsyncadd [#allocation3], 4294966784 }
  0x48   :  { %1807 = dma.done.wait [#allocation6], 16384  }
  0x49   :  { %1808 = vsyncadd [#allocation6], 4294950912 }
  0x4a   :  { %1809 = dma.done.wait [#allocation9], 2048  }
  0x4b   :  { %1810 = vsyncadd [#allocation9], 4294965248  ;;  %v1483_v0 = vld [vmem:[#allocation5 + $0x4] ss:$16 sps:$4 sm:$0xff]   ;;  %v1485_v1 = vld [vmem:[#allocation5] ss:$16 sps:$4 sm:$0xff]  }
  0x4c   :  { %495 = vmatprep.subr.bf16.mxu1 %v1483_v0  ;;  %v1486_v2 = vld [vmem:[#allocation5 + $0x24] ss:$16 sps:$4 sm:$0xff]   ;;  %v1488_v3 = vld [vmem:[#allocation5 + $0x20] ss:$16 sps:$4 sm:$0xff]   ;;  %v84_v13 = vld [vmem:[#allocation2 + $0x8] sm:$0xff]  ;;  %s1823_s9 = smov [#allocation10]  }
  0x4d   :  { %496 = vmatpush1.bf16.msra.mxu1 %v1485_v1  ;;  %v1489_v4 = vld [vmem:[#allocation5 + $0x44] ss:$16 sps:$4 sm:$0xff]   ;;  %v1491_v5 = vld [vmem:[#allocation5 + $0x40] ss:$16 sps:$4 sm:$0xff]   ;;  %v86_v14 = vld [vmem:[#allocation2 + $0x18] sm:$0xff]  ;;  %s1274_s10 = sshll.u32 %s1823_s9, 4  ;;  %s1275_s10 = int_to_ptr.vmem [resolvable:$true] %s1274_s10 }
  0x4e   :  { %497 = vmatprep.subr.bf16.mxu1 %v1486_v2  ;;  %v1492_v6 = vld [vmem:[#allocation5 + $0x64] ss:$16 sps:$4 sm:$0xff]   ;;  %v1494_v7 = vld [vmem:[#allocation5 + $0x60] ss:$16 sps:$4 sm:$0xff]   ;;  %v1922_v15 = vpack.c.bf16 %v86_v14, %v84_v13  ;;  %v1533_v46 = vld [vmem:[#allocation5 + $0xc] ss:$16 sps:$4 sm:$0xff]   ;;  %p1788_p5 = scmp.lt.s32.totalorder %s1275_s10, %s1275_s10 }
  0x4f   :  { %v1495_v8 = vld [vmem:[#allocation5 + $0x84] ss:$16 sps:$4 sm:$0xff]   ;;  %v1497_v9 = vld [vmem:[#allocation5 + $0x80] ss:$16 sps:$4 sm:$0xff]   ;;  %v1531_v49 = vld [vmem:[#allocation5 + $0x8] ss:$16 sps:$4 sm:$0xff]  }
  0x50   :  { %v1498_v10 = vld [vmem:[#allocation5 + $0xa4] ss:$16 sps:$4 sm:$0xff]   ;;  %v1500_v11 = vld [vmem:[#allocation5 + $0xa0] ss:$16 sps:$4 sm:$0xff]   ;;  %527 = vmatprep.mubr.bf16.mxu1 %v1922_v15  ;;  %v1536_v51 = vld [vmem:[#allocation5 + $0x2c] ss:$16 sps:$4 sm:$0xff]  }
  0x51   :  { %498 = vmatpush1.bf16.msra.mxu1 %v1488_v3  ;;  %v1501_v12 = vld [vmem:[#allocation5 + $0xc4] ss:$16 sps:$4 sm:$0xff]   ;;  %v1503_v16 = vld [vmem:[#allocation5 + $0xc0] ss:$16 sps:$4 sm:$0xff]   ;;  %v1534_v54 = vld [vmem:[#allocation5 + $0x28] ss:$16 sps:$4 sm:$0xff]  }
  0x52   :  { %499 = vmatprep.subr.bf16.mxu1 %v1489_v4  ;;  %v1504_v17 = vld [vmem:[#allocation5 + $0xe4] ss:$16 sps:$4 sm:$0xff]   ;;  %v1506_v18 = vld [vmem:[#allocation5 + $0xe0] ss:$16 sps:$4 sm:$0xff]   ;;  %v1539_v55 = vld [vmem:[#allocation5 + $0x4c] ss:$16 sps:$4 sm:$0xff]  }
  0x53   :  { %v1507_v19 = vld [vmem:[#allocation5 + $0x104] ss:$16 sps:$4 sm:$0xff]   ;;  %v1509_v20 = vld [vmem:[#allocation5 + $0x100] ss:$16 sps:$4 sm:$0xff]   ;;  %v1537_v58 = vld [vmem:[#allocation5 + $0x48] ss:$16 sps:$4 sm:$0xff]  }
  0x54   :  { %v1510_v21 = vld [vmem:[#allocation5 + $0x124] ss:$16 sps:$4 sm:$0xff]   ;;  %v1512_v22 = vld [vmem:[#allocation5 + $0x120] ss:$16 sps:$4 sm:$0xff]   ;;  %v1542_v59 = vld [vmem:[#allocation5 + $0x6c] ss:$16 sps:$4 sm:$0xff]  }
  0x55   :  { %500 = vmatpush1.bf16.msra.mxu1 %v1491_v5  ;;  %v1513_v23 = vld [vmem:[#allocation5 + $0x144] ss:$16 sps:$4 sm:$0xff]   ;;  %v1515_v24 = vld [vmem:[#allocation5 + $0x140] ss:$16 sps:$4 sm:$0xff]   ;;  %v1540_v62 = vld [vmem:[#allocation5 + $0x68] ss:$16 sps:$4 sm:$0xff]  }
  0x56   :  { %501 = vmatprep.subr.bf16.mxu1 %v1492_v6  ;;  %v1516_v25 = vld [vmem:[#allocation5 + $0x164] ss:$16 sps:$4 sm:$0xff]   ;;  %v1518_v26 = vld [vmem:[#allocation5 + $0x160] ss:$16 sps:$4 sm:$0xff]   ;;  %v1545_v63 = vld [vmem:[#allocation5 + $0x8c] ss:$16 sps:$4 sm:$0xff]  }
  0x57   :  { %v1519_v27 = vld [vmem:[#allocation5 + $0x184] ss:$16 sps:$4 sm:$0xff]   ;;  %v1581_v29 = vld [vmem:[#allocation7] ss:$8 sps:$4 sm:$0xff]   ;;  %v1584_v33 = vld [vmem:[#allocation7 + $0x10] ss:$8 sps:$4 sm:$0xff]  }
  0x58   :  { %v1579_v28 = vld [vmem:[#allocation7 + $0x4] ss:$8 sps:$4 sm:$0xff]   ;;  %v1521_v30 = vld [vmem:[#allocation5 + $0x180] ss:$16 sps:$4 sm:$0xff]   ;;  %v1582_v31 = vld [vmem:[#allocation7 + $0x14] ss:$8 sps:$4 sm:$0xff]  }
  0x59   :  { %502 = vmatpush1.bf16.msra.mxu1 %v1494_v7  ;;  %989 = vmatprep.subr.bf16.mxu0 %v1579_v28  ;;  %v1522_v32 = vld [vmem:[#allocation5 + $0x1a4] ss:$16 sps:$4 sm:$0xff]   ;;  %v1524_v35 = vld [vmem:[#allocation5 + $0x1a0] ss:$16 sps:$4 sm:$0xff]   ;;  %v1543_v2 = vld [vmem:[#allocation5 + $0x88] ss:$16 sps:$4 sm:$0xff]  }
  0x5a   :  { %503 = vmatprep.subr.bf16.mxu1 %v1495_v8  ;;  %990 = vmatpush1.bf16.msra.mxu0 %v1581_v29  ;;  %v1585_v34 = vld [vmem:[#allocation7 + $0x24] ss:$8 sps:$4 sm:$0xff]   ;;  %v1587_v37 = vld [vmem:[#allocation7 + $0x20] ss:$8 sps:$4 sm:$0xff]   ;;  %v1588_v38 = vld [vmem:[#allocation7 + $0x34] ss:$8 sps:$4 sm:$0xff]  }
  0x5b   :  { %991 = vmatprep.subr.bf16.mxu0 %v1582_v31  ;;  %v1525_v36 = vld [vmem:[#allocation5 + $0x1c4] ss:$16 sps:$4 sm:$0xff]   ;;  %v1527_v39 = vld [vmem:[#allocation5 + $0x1c0] ss:$16 sps:$4 sm:$0xff]   ;;  %v1548_v3 = vld [vmem:[#allocation5 + $0xac] ss:$16 sps:$4 sm:$0xff]  }
  0x5c   :  { %v1528_v40 = vld [vmem:[#allocation5 + $0x1e4] ss:$16 sps:$4 sm:$0xff]   ;;  %v1590_v41 = vld [vmem:[#allocation7 + $0x30] ss:$8 sps:$4 sm:$0xff]   ;;  %v1593_v47 = vld [vmem:[#allocation7 + $0x40] ss:$8 sps:$4 sm:$0xff]  }
  0x5d   :  { %504 = vmatpush1.bf16.msra.mxu1 %v1497_v9  ;;  %v1591_v42 = vld [vmem:[#allocation7 + $0x44] ss:$8 sps:$4 sm:$0xff]   ;;  %v1530_v43 = vld [vmem:[#allocation5 + $0x1e0] ss:$16 sps:$4 sm:$0xff]   ;;  %v1594_v48 = vld [vmem:[#allocation7 + $0x54] ss:$8 sps:$4 sm:$0xff]  }
  0x5e   :  { %505 = vmatprep.subr.bf16.mxu1 %v1498_v10  ;;  %992 = vmatpush1.bf16.msra.mxu0 %v1584_v33  ;;  %v83_v44 = vld [vmem:[#allocation2] sm:$0xff]  ;;  %v85_v45 = vld [vmem:[#allocation2 + $0x10] sm:$0xff]  ;;  %v1546_v6 = vld [vmem:[#allocation5 + $0xa8] ss:$16 sps:$4 sm:$0xff]   ;;  %s1783_s11 = scalar_lea.vmem %s1275_s10, 128 }
  0x5f   :  { %993 = vmatprep.subr.bf16.mxu0 %v1585_v34  ;;  %v1925_v50 = vpack.c.bf16 %v85_v45, %v83_v44  ;;  %v1596_v52 = vld [vmem:[#allocation7 + $0x50] ss:$8 sps:$4 sm:$0xff]   ;;  %v1597_v53 = vld [vmem:[#allocation7 + $0x64] ss:$8 sps:$4 sm:$0xff]   ;;  %v1599_v56 = vld [vmem:[#allocation7 + $0x60] ss:$8 sps:$4 sm:$0xff]   ;;  %p1784_p4 = scmp.ne.s32.totalorder %s1275_s10, %s1783_s11  ;;  %p1789_p6 = scmp.lt.s32.totalorder %s1783_s11, %s1783_s11 }
  0x60   :  { %v1600_v57 = vld [vmem:[#allocation7 + $0x74] ss:$8 sps:$4 sm:$0xff]   ;;  %v1602_v60 = vld [vmem:[#allocation7 + $0x70] ss:$8 sps:$4 sm:$0xff]   ;;  %v1603_v61 = vld [vmem:[#allocation7 + $0x84] ss:$8 sps:$4 sm:$0xff]  }
  0x61   :  { %506 = vmatpush1.bf16.msra.mxu1 %v1500_v11  ;;  %v1605_v0 = vld [vmem:[#allocation7 + $0x80] ss:$8 sps:$4 sm:$0xff]   ;;  %v1606_v1 = vld [vmem:[#allocation7 + $0x94] ss:$8 sps:$4 sm:$0xff]   ;;  %v1608_v4 = vld [vmem:[#allocation7 + $0x90] ss:$8 sps:$4 sm:$0xff]   ;;  %p1790_p7 = por %p1789_p6, %p1788_p5 }
  0x62   :  { %507 = vmatprep.subr.bf16.mxu1 %v1501_v12  ;;  %994 = vmatpush1.bf16.msra.mxu0 %v1587_v37  ;;  %v1609_v5 = vld [vmem:[#allocation7 + $0xa4] ss:$8 sps:$4 sm:$0xff]   ;;  %v1611_v8 = vld [vmem:[#allocation7 + $0xa0] ss:$8 sps:$4 sm:$0xff]   ;;  %v1612_v9 = vld [vmem:[#allocation7 + $0xb4] ss:$8 sps:$4 sm:$0xff]  }
  0x63   :  { %995 = vmatprep.subr.bf16.mxu0 %v1588_v38  ;;  %v1551_v7 = vld [vmem:[#allocation5 + $0xcc] ss:$16 sps:$4 sm:$0xff]   ;;  %v1549_v10 = vld [vmem:[#allocation5 + $0xc8] ss:$16 sps:$4 sm:$0xff]   ;;  %v1680_v44 = vld [vmem:[#allocation8 + $0x10] sm:$0xff]   ;;  %p1791_p8 = pnand %p1790_p7, %p1784_p4 }
  0x64   :  { %v1554_v11 = vld [vmem:[#allocation5 + $0xec] ss:$16 sps:$4 sm:$0xff]   ;;  %v1614_v12 = vld [vmem:[#allocation7 + $0xb0] ss:$8 sps:$4 sm:$0xff]  }
  0x65   :  { %508 = vmatpush1.bf16.msra.mxu1 %v1503_v16  ;;  %v1615_v13 = vld [vmem:[#allocation7 + $0xc4] ss:$8 sps:$4 sm:$0xff]   ;;  %v1552_v14 = vld [vmem:[#allocation5 + $0xe8] ss:$16 sps:$4 sm:$0xff]  }
  0x66   :  { %509 = vmatprep.subr.bf16.mxu1 %v1504_v17  ;;  %996 = vmatpush1.bf16.msra.mxu0 %v1590_v41  ;;  %v1617_v16 = vld [vmem:[#allocation7 + $0xc0] ss:$8 sps:$4 sm:$0xff]   ;;  %v1618_v17 = vld [vmem:[#allocation7 + $0xd4] ss:$8 sps:$4 sm:$0xff]   ;;  %v1620_v33 = vld [vmem:[#allocation7 + $0xd0] ss:$8 sps:$4 sm:$0xff]  }
  0x67   :  { %997 = vmatprep.subr.bf16.mxu0 %v1591_v42  ;;  %v1570_v28 = vld [vmem:[#allocation5 + $0x1a8] ss:$16 sps:$4 sm:$0xff]   ;;  %v1575_v29 = vld [vmem:[#allocation5 + $0x1cc] ss:$16 sps:$4 sm:$0xff]  }
  0x68   :  { %v1578_v31 = vld [vmem:[#allocation5 + $0x1ec] ss:$16 sps:$4 sm:$0xff]   ;;  %v1626_v37 = vld [vmem:[#allocation7 + $0xf0] ss:$8 sps:$4 sm:$0xff]  }
  0x69   :  { %510 = vmatpush1.bf16.msra.mxu1 %v1506_v18  ;;  %v1555_v18 = vld [vmem:[#allocation5 + $0x108] ss:$16 sps:$4 sm:$0xff]   ;;  %v1621_v34 = vld [vmem:[#allocation7 + $0xe4] ss:$8 sps:$4 sm:$0xff]  }
  0x6a   :  { %511 = vmatprep.subr.bf16.mxu1 %v1507_v19  ;;  %998 = vmatpush1.bf16.msra.mxu0 %v1593_v47  ;;  %v1560_v19 = vld [vmem:[#allocation5 + $0x12c] ss:$16 sps:$4 sm:$0xff]   ;;  %v1683_v47 = vld [vmem:[#allocation8 + $0x60] sm:$0xff]  }
  0x6b   :  { %999 = vmatprep.subr.bf16.mxu0 %v1594_v48  ;;  %v1629_v38 = vld [vmem:[#allocation7 + $0x104] ss:$8 sps:$4 sm:$0xff]   ;;  %v1681_v45 = vld [vmem:[#allocation8 + $0x58] sm:$0xff]  }
  0x6c   :  { %v1677_v41 = vld [vmem:[#allocation8 + $0x48] sm:$0xff]   ;;  %v1684_v48 = vld [vmem:[#allocation8 + $0x20] sm:$0xff]  }
  0x6d   :  { %512 = vmatpush1.bf16.msra.mxu1 %v1509_v20  ;;  %v1558_v20 = vld [vmem:[#allocation5 + $0x128] ss:$16 sps:$4 sm:$0xff]  }
  0x6e   :  { %513 = vmatprep.subr.bf16.mxu1 %v1510_v21  ;;  %1000 = vmatpush1.bf16.msra.mxu0 %v1596_v52  ;;  %v1563_v21 = vld [vmem:[#allocation5 + $0x14c] ss:$16 sps:$4 sm:$0xff]  }
  0x6f   :  { %1001 = vmatprep.subr.bf16.mxu0 %v1597_v53  ;;  %v1678_v42 = vld [vmem:[#allocation8 + $0x8] sm:$0xff]   ;;  %v1936_v53 = vld [vmem:[%s1976_s2] sm:$0xf] }
  0x71   :  { %514 = vmatpush1.bf16.msra.mxu1 %v1512_v22  ;;  %v1561_v22 = vld [vmem:[#allocation5 + $0x148] ss:$16 sps:$4 sm:$0xff]  }
  0x72   :  { %515 = vmatprep.subr.bf16.mxu1 %v1513_v23  ;;  %1002 = vmatpush1.bf16.msra.mxu0 %v1599_v56  ;;  %v1566_v23 = vld [vmem:[#allocation5 + $0x16c] ss:$16 sps:$4 sm:$0xff]  }
  0x73   :  { %1003 = vmatprep.subr.bf16.mxu0 %v1600_v57 }
  0x75   :  { %516 = vmatpush1.bf16.msra.mxu1 %v1515_v24  ;;  %v1564_v24 = vld [vmem:[#allocation5 + $0x168] ss:$16 sps:$4 sm:$0xff]  }
  0x76   :  { %517 = vmatprep.subr.bf16.mxu1 %v1516_v25  ;;  %1004 = vmatpush1.bf16.msra.mxu0 %v1602_v60  ;;  %v1569_v25 = vld [vmem:[#allocation5 + $0x18c] ss:$16 sps:$4 sm:$0xff]  }
  0x77   :  { %1005 = vmatprep.subr.bf16.mxu0 %v1603_v61 }
  0x79   :  { %518 = vmatpush1.bf16.msra.mxu1 %v1518_v26  ;;  %v1567_v26 = vld [vmem:[#allocation5 + $0x188] ss:$16 sps:$4 sm:$0xff]  }
  0x7a   :  { %519 = vmatprep.subr.bf16.mxu1 %v1519_v27  ;;  %1006 = vmatpush1.bf16.msra.mxu0 %v1605_v0  ;;  %v1572_v27 = vld [vmem:[#allocation5 + $0x1ac] ss:$16 sps:$4 sm:$0xff]  }
  0x7b   :  { %1007 = vmatprep.subr.bf16.mxu0 %v1606_v1 }
  0x7d   :  { %520 = vmatpush1.bf16.msra.mxu1 %v1521_v30  ;;  %v1573_v30 = vld [vmem:[#allocation5 + $0x1c8] ss:$16 sps:$4 sm:$0xff]  }
  0x7e   :  { %521 = vmatprep.subr.bf16.mxu1 %v1522_v32  ;;  %1008 = vmatpush1.bf16.msra.mxu0 %v1608_v4  ;;  %v1576_v32 = vld [vmem:[#allocation5 + $0x1e8] ss:$16 sps:$4 sm:$0xff]  }
  0x7f   :  { %1009 = vmatprep.subr.bf16.mxu0 %v1609_v5 }
  0x81   :  { %522 = vmatpush1.bf16.msra.mxu1 %v1524_v35  ;;  %v1623_v35 = vld [vmem:[#allocation7 + $0xe0] ss:$8 sps:$4 sm:$0xff]  }
  0x82   :  { %523 = vmatprep.subr.bf16.mxu1 %v1525_v36  ;;  %1010 = vmatpush1.bf16.msra.mxu0 %v1611_v8  ;;  %v1624_v36 = vld [vmem:[#allocation7 + $0xf4] ss:$8 sps:$4 sm:$0xff]  }
  0x83   :  { %1011 = vmatprep.subr.bf16.mxu0 %v1612_v9  ;;  %v1632_v8 = vld [vmem:[#allocation7 + $0x114] ss:$8 sps:$4 sm:$0xff]   ;;  %v1630_v9 = vld [vmem:[#allocation7 + $0x110] ss:$8 sps:$4 sm:$0xff]  }
  0x85   :  { %524 = vmatpush1.bf16.msra.mxu1 %v1527_v39  ;;  %v1675_v39 = vld [vmem:[#allocation8 + $0x40] sm:$0xff]  }
  0x86   :  { %525 = vmatprep.subr.bf16.mxu1 %v1528_v40  ;;  %1012 = vmatpush1.bf16.msra.mxu0 %v1614_v12  ;;  %v1676_v40 = vld [vmem:[#allocation8] sm:$0xff]   ;;  %v1638_v12 = vld [vmem:[#allocation7 + $0x134] ss:$8 sps:$4 sm:$0xff]  }
  0x87   :  { %1013 = vmatprep.subr.bf16.mxu0 %v1615_v13  ;;  %v1636_v13 = vld [vmem:[#allocation7 + $0x130] ss:$8 sps:$4 sm:$0xff]  }
  0x89   :  { %526 = vmatpush1.bf16.msra.mxu1 %v1530_v43  ;;  %v1679_v43 = vld [vmem:[#allocation8 + $0x50] sm:$0xff]  }
  0x8a   :  { %538 = vmatprep.subr.bf16.mxu1 %v1533_v46  ;;  %1014 = vmatpush1.bf16.msra.mxu0 %v1617_v16  ;;  %v1682_v46 = vld [vmem:[#allocation8 + $0x18] sm:$0xff]  }
  0x8b   :  { %1015 = vmatprep.subr.bf16.mxu0 %v1618_v17  ;;  %v1644_v16 = vld [vmem:[#allocation7 + $0x154] ss:$8 sps:$4 sm:$0xff]   ;;  %v1642_v17 = vld [vmem:[#allocation7 + $0x150] ss:$8 sps:$4 sm:$0xff]  }
  0x8c   :  { %528 = vmatmul.mubr.bf16.vlgmr.msra.gmra.mrb[0].mxu1 %v1925_v50 }
  0x8d   :  { %539 = vmatpush1.bf16.msra.mxu1 %v1531_v49  ;;  %570 = vmatprep.mubr.bf16.mxu1 %v1922_v15  ;;  %v1557_v15 = vld [vmem:[#allocation5 + $0x10c] ss:$16 sps:$4 sm:$0xff]  }
  0x8e   :  { %540 = vmatprep.subr.bf16.mxu1 %v1536_v51  ;;  %1016 = vmatpush1.bf16.msra.mxu0 %v1620_v33  ;;  %v1685_v49 = vld [vmem:[#allocation8 + $0x68] sm:$0xff]  }
  0x8f   :  { %1017 = vmatprep.subr.bf16.mxu0 %v1621_v34 }
  0x91   :  { %541 = vmatpush1.bf16.msra.mxu1 %v1534_v54 }
  0x92   :  { %542 = vmatprep.subr.bf16.mxu1 %v1539_v55  ;;  %1018 = vmatpush1.bf16.msra.mxu0 %v1623_v35  ;;  %v1666_v35 = vld [vmem:[#allocation7 + $0x1d0] ss:$8 sps:$4 sm:$0xff]  }
  0x93   :  { %1019 = vmatprep.subr.bf16.mxu0 %v1624_v36 }
  0x95   :  { %543 = vmatpush1.bf16.msra.mxu1 %v1537_v58 }
  0x96   :  { %544 = vmatprep.subr.bf16.mxu1 %v1542_v59  ;;  %1020 = vmatpush1.bf16.msra.mxu0 %v1626_v37  ;;  %v1671_v37 = vld [vmem:[#allocation7 + $0x1e4] ss:$8 sps:$4 sm:$0xff]  }
  0x97   :  { %1032 = vmatprep.subr.bf16.mxu0 %v1629_v38 }
  0x99   :  { %545 = vmatpush1.bf16.msra.mxu1 %v1540_v62 }
  0x9a   :  { %546 = vmatprep.subr.bf16.mxu1 %v1545_v63 }
  0x9d   :  { %547 = vmatpush1.bf16.msra.mxu1 %v1543_v2 }
  0x9e   :  { %548 = vmatprep.subr.bf16.mxu1 %v1548_v3 }
  0xa1   :  { %549 = vmatpush1.bf16.msra.mxu1 %v1546_v6 }
  0xa2   :  { %550 = vmatprep.subr.bf16.mxu1 %v1551_v7  ;;  %v1627_v7 = vld [vmem:[#allocation7 + $0x100] ss:$8 sps:$4 sm:$0xff]  }
  0xa5   :  { %551 = vmatpush1.bf16.msra.mxu1 %v1549_v10  ;;  %v1635_v10 = vld [vmem:[#allocation7 + $0x124] ss:$8 sps:$4 sm:$0xff]  }
  0xa6   :  { %552 = vmatprep.subr.bf16.mxu1 %v1554_v11  ;;  %v1633_v11 = vld [vmem:[#allocation7 + $0x120] ss:$8 sps:$4 sm:$0xff]  }
  0xa9   :  { %553 = vmatpush1.bf16.msra.mxu1 %v1552_v14  ;;  %v1641_v14 = vld [vmem:[#allocation7 + $0x144] ss:$8 sps:$4 sm:$0xff]  }
  0xaa   :  { %554 = vmatprep.subr.bf16.mxu1 %v1557_v15  ;;  %v1639_v15 = vld [vmem:[#allocation7 + $0x140] ss:$8 sps:$4 sm:$0xff]  }
  0xad   :  { %555 = vmatpush1.bf16.msra.mxu1 %v1555_v18  ;;  %v1647_v18 = vld [vmem:[#allocation7 + $0x164] ss:$8 sps:$4 sm:$0xff]  }
  0xae   :  { %556 = vmatprep.subr.bf16.mxu1 %v1560_v19  ;;  %v1645_v19 = vld [vmem:[#allocation7 + $0x160] ss:$8 sps:$4 sm:$0xff]  }
  0xb1   :  { %557 = vmatpush1.bf16.msra.mxu1 %v1558_v20  ;;  %v1650_v20 = vld [vmem:[#allocation7 + $0x174] ss:$8 sps:$4 sm:$0xff]  }
  0xb2   :  { %558 = vmatprep.subr.bf16.mxu1 %v1563_v21  ;;  %v1648_v21 = vld [vmem:[#allocation7 + $0x170] ss:$8 sps:$4 sm:$0xff]  }
  0xb5   :  { %559 = vmatpush1.bf16.msra.mxu1 %v1561_v22  ;;  %v1653_v22 = vld [vmem:[#allocation7 + $0x184] ss:$8 sps:$4 sm:$0xff]  }
  0xb6   :  { %560 = vmatprep.subr.bf16.mxu1 %v1566_v23  ;;  %v1651_v23 = vld [vmem:[#allocation7 + $0x180] ss:$8 sps:$4 sm:$0xff]  }
  0xb9   :  { %561 = vmatpush1.bf16.msra.mxu1 %v1564_v24  ;;  %v1656_v24 = vld [vmem:[#allocation7 + $0x194] ss:$8 sps:$4 sm:$0xff]  }
  0xba   :  { %562 = vmatprep.subr.bf16.mxu1 %v1569_v25  ;;  %v1654_v25 = vld [vmem:[#allocation7 + $0x190] ss:$8 sps:$4 sm:$0xff]  }
  0xbd   :  { %563 = vmatpush1.bf16.msra.mxu1 %v1567_v26  ;;  %v1659_v26 = vld [vmem:[#allocation7 + $0x1a4] ss:$8 sps:$4 sm:$0xff]  }
  0xbe   :  { %564 = vmatprep.subr.bf16.mxu1 %v1572_v27  ;;  %v1657_v27 = vld [vmem:[#allocation7 + $0x1a0] ss:$8 sps:$4 sm:$0xff]  }
  0xc1   :  { %565 = vmatpush1.bf16.msra.mxu1 %v1570_v28  ;;  %v1662_v28 = vld [vmem:[#allocation7 + $0x1b4] ss:$8 sps:$4 sm:$0xff]  }
  0xc2   :  { %566 = vmatprep.subr.bf16.mxu1 %v1575_v29  ;;  %v1660_v29 = vld [vmem:[#allocation7 + $0x1b0] ss:$8 sps:$4 sm:$0xff]  }
  0xc5   :  { %567 = vmatpush1.bf16.msra.mxu1 %v1573_v30  ;;  %v1665_v30 = vld [vmem:[#allocation7 + $0x1c4] ss:$8 sps:$4 sm:$0xff]  }
  0xc6   :  { %568 = vmatprep.subr.bf16.mxu1 %v1578_v31  ;;  %v1663_v31 = vld [vmem:[#allocation7 + $0x1c0] ss:$8 sps:$4 sm:$0xff]  }
  0xc9   :  { %569 = vmatpush1.bf16.msra.mxu1 %v1576_v32  ;;  %v1668_v32 = vld [vmem:[#allocation7 + $0x1d4] ss:$8 sps:$4 sm:$0xff]  }
  0xca   :  { %1442 = vmatprep.subr.bf16.mxu1 %v1675_v39 }
  0xcc   :  { %571 = vmatmul.mubr.bf16.vlgmr.msra.gmra.mrb[4].mxu1 %v1925_v50  ;;  %v155_v50 = vlaneseq }
  0xcd   :  { %1443 = vmatpush3.bf16.msra.mxu1 %v1676_v40  ;;  %v1669_v40 = vld [vmem:[#allocation7 + $0x1e0] ss:$8 sps:$4 sm:$0xff]  }
  0xce   :  { %1444 = vmatprep.subr.bf16.mxu1 %v1677_v41  ;;  %v1930_v51 = vshrl.u32 %v155_v50, 7 }
  0xd0   :  { %v157_v52 = vsub.s32 0, %v1930_v51  ;;  %v161_v54 = vsub.s32 1, %v1930_v51  ;;  %v165_v33 = vsub.s32 2, %v1930_v51  ;;  %v169_v34 = vsub.s32 3, %v1930_v51  ;;  %v1416_v51 = vld [vmem:[%s1980_s6] ss:$0 sm:$0xff] }
  0xd1   :  { %1445 = vmatpush3.bf16.msra.mxu1 %v1678_v42 }
  0xd2   :  { %1446 = vmatprep.subr.bf16.mxu1 %v1679_v43  ;;  %v158_v55 = vrot.slane %v1936_v53, %v157_v52  ;;  %v162_v56 = vrot.slane %v1936_v53, %v161_v54  ;;  %v166_v36 = vrot.slane %v1936_v53, %v165_v33  ;;  %v170_v38 = vrot.slane %v1936_v53, %v169_v34  ;;  %v1674_v43 = vld [vmem:[#allocation7 + $0x1f4] ss:$8 sps:$4 sm:$0xff]  }
  0xd5   :  { %1447 = vmatpush3.bf16.msra.mxu1 %v1680_v44 }
  0xd6   :  { %1448 = vmatprep.subr.bf16.mxu1 %v1681_v45 }
  0xd9   :  { %1449 = vmatpush3.bf16.msra.mxu1 %v1682_v46 }
  0xda   :  { %1450 = vmatprep.subr.bf16.mxu1 %v1683_v47 }
  0xdd   :  { %1451 = vmatpush3.bf16.msra.mxu1 %v1684_v48 }
  0xde   :  { %1452 = vmatprep.subr.bf16.mxu1 %v1685_v49  ;;  %v1672_v49 = vld [vmem:[#allocation7 + $0x1f0] ss:$8 sps:$4 sm:$0xff]  }
 0x15f   :  { %v529_v57 = vpop.f32.mrb[0].mxu1 }
 0x160   :  { %v530_v58 = vadd.f32 %v529_v57, %v158_v55  ;;  %v531_v59 = vpop.f32.mrb[1].mxu1 }
 0x161   :  { %v532_v60 = vadd.f32 %v531_v59, %v162_v56  ;;  %v533_v61 = vpop.f32.mrb[2].mxu1  ;;  %v1686_v59 = vld [vmem:[#allocation8 + $0x28] sm:$0xff]  }
 0x162   :  { %v581_v62 = vmax.f32 %v530_v58, 0.0  ;;  %v534_v63 = vadd.f32 %v533_v61, %v158_v55  ;;  %v535_v0 = vpop.f32.mrb[3].mxu1  ;;  %1453 = vmatpush3.bf16.msra.mxu1 %v1686_v59  ;;  %v1688_v61 = vld [vmem:[#allocation8 + $0x30] sm:$0xff]  }
 0x163   :  { %v536_v1 = vadd.f32 %v535_v0, %v162_v56  ;;  %v582_v3 = vmax.f32 %v532_v60, 0.0  ;;  %v1687_v60 = vld [vmem:[#allocation8 + $0x70] sm:$0xff]   ;;  %v657_v0 = vld [vmem:[%s1978_s4] sm:$0x3] }
 0x164   :  { %v585_v2 = vmax.f32 %v534_v63, 0.0  ;;  %1454 = vmatprep.subr.bf16.mxu1 %v1687_v60  ;;  %v1690_v63 = vld [vmem:[#allocation8 + $0x38] sm:$0xff]  }
 0x165   :  { %v586_v4 = vmax.f32 %v536_v1, 0.0  ;;  %v662_v1 = vrot.slane %v657_v0, %v157_v52 }
 0x166   :  { %v589_v5 = vpack.c.bf16 %v585_v2, %v581_v62  ;;  %1455 = vmatpush3.bf16.msra.mxu1 %v1688_v61  ;;  %v1689_v62 = vld [vmem:[#allocation8 + $0x78] sm:$0xff]   ;;  %v666_v2 = vrot.slane %v657_v0, %v161_v54 }
 0x167   :  { %v590_v6 = vpack.c.bf16 %v586_v4, %v582_v3  ;;  %1456 = vmatprep.subr.bf16.mxu1 %v1689_v62 }
 0x169   :  { %1021 = vmatprep.mubr.bf16.mxu0 %v590_v6 }
 0x16a   :  { %1022 = vmatmul.mubr.bf16.vlgmr.msra.gmra.mrb[0].mxu0 %v589_v5  ;;  %1457 = vmatpush3.bf16.msra.mxu1 %v1690_v63 }
 0x16b   :  { %1033 = vmatpush1.bf16.msra.mxu0 %v1627_v7 }
 0x16c   :  { %1034 = vmatprep.subr.bf16.mxu0 %v1632_v8 }
 0x16f   :  { %1035 = vmatpush1.bf16.msra.mxu0 %v1630_v9 }
 0x170   :  { %1036 = vmatprep.subr.bf16.mxu0 %v1635_v10 }
 0x173   :  { %1037 = vmatpush1.bf16.msra.mxu0 %v1633_v11 }
 0x174   :  { %1038 = vmatprep.subr.bf16.mxu0 %v1638_v12 }
 0x177   :  { %1039 = vmatpush1.bf16.msra.mxu0 %v1636_v13 }
 0x178   :  { %1040 = vmatprep.subr.bf16.mxu0 %v1641_v14 }
 0x17b   :  { %1041 = vmatpush1.bf16.msra.mxu0 %v1639_v15 }
 0x17c   :  { %1042 = vmatprep.subr.bf16.mxu0 %v1644_v16 }
 0x17f   :  { %1043 = vmatpush1.bf16.msra.mxu0 %v1642_v17 }
 0x180   :  { %1044 = vmatprep.subr.bf16.mxu0 %v1647_v18 }
 0x183   :  { %1045 = vmatpush1.bf16.msra.mxu0 %v1645_v19 }
 0x184   :  { %1046 = vmatprep.subr.bf16.mxu0 %v1650_v20 }
 0x187   :  { %1047 = vmatpush1.bf16.msra.mxu0 %v1648_v21 }
 0x188   :  { %1048 = vmatprep.subr.bf16.mxu0 %v1653_v22 }
 0x18b   :  { %1049 = vmatpush1.bf16.msra.mxu0 %v1651_v23 }
 0x18c   :  { %1050 = vmatprep.subr.bf16.mxu0 %v1656_v24 }
 0x18f   :  { %1051 = vmatpush1.bf16.msra.mxu0 %v1654_v25 }
 0x190   :  { %1052 = vmatprep.subr.bf16.mxu0 %v1659_v26 }
 0x193   :  { %1053 = vmatpush1.bf16.msra.mxu0 %v1657_v27 }
 0x194   :  { %1054 = vmatprep.subr.bf16.mxu0 %v1662_v28 }
 0x197   :  { %1055 = vmatpush1.bf16.msra.mxu0 %v1660_v29 }
 0x198   :  { %1056 = vmatprep.subr.bf16.mxu0 %v1665_v30 }
 0x19b   :  { %1057 = vmatpush1.bf16.msra.mxu0 %v1663_v31 }
 0x19c   :  { %1058 = vmatprep.subr.bf16.mxu0 %v1668_v32 }
 0x19f   :  { %v572_v39 = vpop.f32.mrb[4].mxu1  ;;  %1059 = vmatpush1.bf16.msra.mxu0 %v1666_v35 }
 0x1a0   :  { %v573_v41 = vadd.f32 %v572_v39, %v166_v36  ;;  %v574_v42 = vpop.f32.mrb[5].mxu1  ;;  %1060 = vmatprep.subr.bf16.mxu0 %v1671_v37 }
 0x1a1   :  { %v575_v44 = vadd.f32 %v574_v42, %v170_v38  ;;  %v576_v45 = vpop.f32.mrb[6].mxu1 }
 0x1a2   :  { %v577_v46 = vadd.f32 %v576_v45, %v166_v36  ;;  %v578_v47 = vpop.f32.mrb[7].mxu1  ;;  %v583_v50 = vmax.f32 %v573_v41, 0.0 }
 0x1a3   :  { %v579_v48 = vadd.f32 %v578_v47, %v170_v38  ;;  %1061 = vmatpush1.bf16.msra.mxu0 %v1669_v40  ;;  %v584_v56 = vmax.f32 %v575_v44, 0.0 }
 0x1a4   :  { %v587_v55 = vmax.f32 %v577_v46, 0.0  ;;  %1062 = vmatprep.subr.bf16.mxu0 %v1674_v43 }
 0x1a5   :  { %v588_v57 = vmax.f32 %v579_v48, 0.0 }
 0x1a6   :  { %v591_v53 = vpack.c.bf16 %v587_v55, %v583_v50 }
 0x1a7   :  { %v592_v58 = vpack.c.bf16 %v588_v57, %v584_v56  ;;  %1063 = vmatpush1.bf16.msra.mxu0 %v1672_v49 }
 0x1a9   :  { %1064 = vmatprep.mubr.bf16.mxu0 %v592_v58 }
 0x1aa   :  { %1065 = vmatmul.mubr.bf16.vlgmr.msra.gmra.mrb[0].mxu0 %v591_v53 }
 0x27d   :  { %v1066_v3 = vpop.f32.mrb[0].mxu0 }
 0x27e   :  { %v1464_v4 = vadd.f32 %v1066_v3, %v662_v1  ;;  %v1068_v5 = vpop.f32.mrb[1].mxu0 }
 0x27f   :  { %v1465_v6 = vadd.f32 %v1068_v5, %v666_v2  ;;  %v1070_v7 = vpop.f32.mrb[2].mxu0 }
 0x280   :  { %v1466_v8 = vadd.f32 %v1070_v7, %v662_v1  ;;  %v1072_v9 = vpop.f32.mrb[3].mxu0  ;;  %v1075_v11 = vmax.f32 %v1464_v4, 0.0 }
 0x281   :  { %v1467_v10 = vadd.f32 %v1072_v9, %v666_v2  ;;  %v1076_v13 = vmax.f32 %v1465_v6, 0.0 }
 0x282   :  { %v1077_v12 = vmax.f32 %v1466_v8, 0.0 }
 0x283   :  { %v1078_v14 = vmax.f32 %v1467_v10, 0.0 }
 0x284   :  { %v1079_v15 = vpack.c.bf16 %v1077_v12, %v1075_v11 }
 0x285   :  { %v1080_v16 = vpack.c.bf16 %v1078_v14, %v1076_v13 }
 0x287   :  { %1248 = vmatprep.mubr.bf16.mxu1 %v1080_v16 }
 0x288   :  { %1249 = vmatmul.mubr.bf16.vlgmr.msra.gmra.mrb[8].mxu1 %v1079_v15 }
 0x35b   :  { %v1458_v52 = vpop.f32.mrb[8].mxu1 }
 0x35c   :  { %v1459_v54 = vpop.f32.mrb[9].mxu1 }
 0x35d   :  { %v1460_v17 = vadd.f32 %v1459_v54, %v1458_v52  ;;  %v1461_v18 = vpop.f32.mrb[10].mxu1 }
 0x35e   :  { %v1462_v19 = vpop.f32.mrb[11].mxu1 }
 0x35f   :  { %v1251_v20 = vadd.f32 %v1460_v17, %v1416_v51  ;;  %v1463_v21 = vadd.f32 %v1462_v19, %v1461_v18 }
 0x361   :  { %v1254_v22 = vadd.f32 %v1463_v21, %v1416_v51  ;;  %1691 = vtanh.f32 %v1251_v20 }
 0x363   :  { %1693 = vtanh.f32 %v1254_v22 }
 0x36b   :  { %v1692_v23 = vpop.eup %1691 }
 0x36d   :  { %v1694_v24 = vpop.eup %1693 }
 0x36e   :  { %v1440_v25 = vpack.c.bf16 %v1694_v24, %v1692_v23 }
 0x370   :  { %1441 = vst [vmem:[#allocation10] sm:$0xff] %v1440_v25  }
 0x371   :  { %1794 = shalt.err (!%p1791_p8)
}
 0x372   :  { %s1795_s15 = scalar_lea.hbm %s1981_s7, 128 }
 0x373   :  { %p1796_p9 = scmp.ne.s32.totalorder %s1981_s7, %s1795_s15  ;;  %p1799_p10 = scmp.lt.u32.totalorder %s1795_s15, %s1981_s7 }
 0x375   :  { %p1801_p11 = pnand %p1799_p10, %p1796_p9 }
 0x377   :  { %1804 = shalt.err (!%p1801_p11)
}
 0x378   :  { %1280 = dma.vmem_to_hbm [thread:$0]  %s1275_s10, 128, %s1981_s7, [#allocation4], %s1821_s3, %s1821_s3, %s1822_s25  }
 0x379   :  { %1811 = dma.done.wait [#allocation4], 128  }
 0x37a   :  { %1812 = vsyncadd [#allocation4], 4294967168 }
 0x37b   :  { %1284 = vsyncpa [#allocation3], 1 }
 0x37c   :  { %1285 = vsyncpa [#allocation6], 1 }
 0x37d   :  { %1286 = vsyncpa [#allocation9], 1 }
 0x37e   :  { %1287 = vsyncpa [#allocation4], 1 }

</bundles_post_ra>
